<compile_context>
chip_gen: v7x
topology: tpu7x:2x2x1
jax: 0.10.0
libtpu: 0.0.40
codegen_flags: <defaults>
</compile_context>

<pallas_src>
from functools import lru_cache, partial

import numpy as np
import jax
import jax.numpy as jnp
from jax.experimental import pallas as pl
from jax.experimental.pallas import tpu as pltpu


# ----------------------------------------------------------------------------
# Deterministic constants: per-step 64-element permutations and the 64
# composite (per flag-class) permutation matrices.
# ----------------------------------------------------------------------------
def _swap_stabilizers_row(a: np.ndarray) -> np.ndarray:
    """numpy mirror of _swap_stabilizers for a single (8,2,2,2) row."""
    b = np.transpose(a, (3, 2, 1, 0)).reshape(8, 2, 2, 2)
    return b[[0, 6, 2, 4, 3, 5, 1, 7]]


def _tz_perm(axis: int) -> np.ndarray:
    """Per-row permutation applied where the dual (Z) flag is set."""
    idx = np.arange(64).reshape(8, 2, 2, 2)
    t = _swap_stabilizers_row(idx)
    t = np.roll(t, 1, axis=1 + axis)      # batched dim (-3 + axis) -> row dim (1 + axis)
    t = _swap_stabilizers_row(t)
    return t.reshape(64)


def _tx_perm(axis: int) -> np.ndarray:
    """Per-row permutation applied where the primal (X) flag is set."""
    idx = np.arange(64).reshape(8, 2, 2, 2)
    t = np.roll(idx, 1, axis=3 - axis)    # batched dim (-1 - axis) -> row dim (3 - axis)
    return t.reshape(64)


@lru_cache(maxsize=None)
def _composite_matrices_np() -> np.ndarray:
    """Q[f] (64,64) one-hot so that (S[f,:] @ Q[f])[m] = S[f, c_f[m]] where c_f
    composes the step permutations whose flag bit is set in f.  Cached."""
    perms = []
    for axis in range(3):
        perms.append(_tz_perm(axis))
        perms.append(_tx_perm(axis))
    q = np.zeros((64, 64, 64), dtype=np.float32)
    ar = np.arange(64)
    for f in range(64):
        c = np.arange(64)
        for s in range(6):
            if (f >> s) & 1:
                c = c[perms[s]]          # v_new[m] = v_old[perm_s[m]]  composed
        q[f, c, ar] = 1.0
    return q                              # (64, 64, 64)


# ----------------------------------------------------------------------------
# Flag computation (cheap glue, plain JAX) - mirrors get_z_flag / get_x_flag
# with the inter-iteration lattice permutes folded into the coordinate maps.
# ----------------------------------------------------------------------------
def get_z_flag(synd, l, axis, shift):
    b = synd.shape[0]
    s = synd.reshape(b, l, l, l)
    s = jnp.roll(s, shift, axis=3 - axis)
    s = jnp.sum(s, axis=1 + axis)
    s = jnp.flip(s, axis=-1)
    s = jnp.roll(s, 1, axis=-1)
    c = jnp.cumsum(s, axis=-1)
    c = jnp.roll(c, 1, axis=-1)
    return (c % 2) > 0                     # (b, l, l)


def get_x_flag(synd, l, axis, shift):
    b = synd.shape[0]
    s = synd.reshape(b, l, l, l)
    s = jnp.roll(s, shift, axis=3 - axis)
    s = jnp.sum(s, axis=(1 + axis, 1 + (1 + axis) % 3))
    s = jnp.flip(s, axis=-1)
    s = jnp.roll(s, 1, axis=-1)
    c = jnp.cumsum(s, axis=-1)
    c = jnp.roll(c, 1, axis=-1)
    return (c % 2) > 0                     # (b, l)


def build_flag_index(syndrome, l):
    """Per-site 6-bit flag class index, in ORIGINAL (i, j, k) lattice order.

    Bit s = 2*axis + (0 for Z flag, 1 for X flag).  Returns (b, l**3) int32.
    """
    b = syndrome.shape[0]
    n = l ** 3
    z_synd = syndrome[:, :n]
    chans = [syndrome[:, (c + 1) * n:(c + 2) * n] for c in range(3)]
    shape4 = (b, l, l, l)
    idx = jnp.zeros(shape4, dtype=jnp.int32)
    for axis in range(3):
        Fz = get_z_flag(z_synd, l, axis=axis, shift=0)        # (b, l, l)
        Fx = get_x_flag(chans[axis], l, axis=axis, shift=1)   # (b, l)
        if axis == 0:    # iteration-0 coords = (i, j, k): flag = Fz[b, k, j], Fx[b, k]
            zf = jnp.broadcast_to(jnp.transpose(Fz, (0, 2, 1))[:, None, :, :], shape4)
            xf = jnp.broadcast_to(Fx[:, None, None, :], shape4)
        elif axis == 1:  # iteration-1 coords = (j, k, i): flag = Fz[b, i, k], Fx[b, i]
            zf = jnp.broadcast_to(Fz[:, :, None, :], shape4)
            xf = jnp.broadcast_to(Fx[:, :, None, None], shape4)
        else:            # iteration-2 coords = (k, i, j): flag = Fz[b, j, i], Fx[b, j]
            zf = jnp.broadcast_to(jnp.transpose(Fz, (0, 2, 1))[:, :, :, None], shape4)
            xf = jnp.broadcast_to(Fx[:, None, :, None], shape4)
        idx = idx + zf.astype(jnp.int32) * (1 << (2 * axis))
        idx = idx + xf.astype(jnp.int32) * (1 << (2 * axis + 1))
    return idx.reshape(b, n)


# ----------------------------------------------------------------------------
# Pallas kernel: per-flag-class site sums via one bf16 MXU matmul per block.
# ----------------------------------------------------------------------------
def _class_sum_kernel(flags_ref, v_ref, out_ref):
    # out block index is constant along grid axis 1 (the site/reduction axis)
    # -> output stays resident in VMEM and acts as the accumulator.
    @pl.when(pl.program_id(1) == 0)
    def _():
        out_ref[...] = jnp.zeros_like(out_ref)

    flags = flags_ref[...]                               # (bt, 1, tile) int32
    v = v_ref[...].astype(jnp.bfloat16)                  # (bt, tile, 64) bf16 MXU operand
    bt, tile, _ = v.shape
    n_cls = out_ref.shape[1]                             # 64 * group
    classes = jax.lax.broadcasted_iota(jnp.int32, (bt, n_cls, tile), 1)
    onehot = (classes == flags).astype(jnp.bfloat16)     # exact 0/1 in bf16
    out_ref[...] += jnp.einsum('bct,btn->bcn', onehot, v,
                               preferred_element_type=jnp.float32)


# ----------------------------------------------------------------------------
# Tiling / VMEM-budget heuristics (trace-time Python, shape-only).
# ----------------------------------------------------------------------------
def _vmem_limit_bytes():
    try:
        cap = getattr(pltpu.get_tpu_info(), "vmem_capacity_bytes", None)
    except Exception:
        cap = None
    if not cap:
        cap = 64 * 1024 * 1024                    # conservative (v7x-sized) fallback
    # 48 MiB on v7x (64 MiB physical), 64 MiB on v5e/v6e (128 MiB physical).
    return int(min(64 * 1024 * 1024, max(32 * 1024 * 1024, (cap * 3) // 4)))


def _choose_layout(batch, n_sites_padded, vmem_limit):
    """Pick (group, n_cls, nb, sites_grp, bt, tile).

    group folds up to 4 batch elements into the class dimension for small
    lattices so each MXU matmul has M = 64*group rows and K = group*sites
    (fills the 256-row MXU, removes tiny-K drain overhead).  For large
    lattices K is already fat and group=1 keeps the class-axis temporaries
    small so blocks can be big.
    """
    if n_sites_padded <= 2048:
        group = 4 if batch % 4 == 0 else (2 if batch % 2 == 0 else 1)
    else:
        group = 1
    n_cls = 64 * group
    nb = batch // group
    sites_grp = group * n_sites_padded

    # Conservative live-VMEM bytes per block site:
    #   V f32 double-buffered (512) + flags (64, sublane-padded) + bf16 V copy
    #   (128) + class-axis temporaries (int32 iota + mask + bf16 one-hot ~ 10 B
    #   per class per site).
    per_site = 512 + 64 + 128 + 10 * n_cls
    budget = vmem_limit - 4 * 1024 * 1024
    max_sites = max(8, min(32768, budget // per_site))

    if sites_grp <= max_sites:
        tile = sites_grp
        bt = max(1, min(nb, max_sites // sites_grp))
        while nb % bt:
            bt -= 1
    else:
        bt = 1
        tile = 8
        t = 8
        while t <= max_sites:                     # largest multiple of 8 dividing sites_grp
            if sites_grp % t == 0:
                tile = t
            t += 8
    return group, n_cls, nb, sites_grp, bt, tile


# ----------------------------------------------------------------------------
# Public forward
# ----------------------------------------------------------------------------
@partial(jax.jit, static_argnums=(2,))
def translational_equivariant_pooling_3d(x, syndrome, l):
    """x: (b, l, l, l, 8, 2, 2, 2); syndrome: (b, 4*l**3) -> (b, 8, 2, 2, 2)."""
    b = x.shape[0]
    n_sites = l ** 3
    v = x.reshape(b, n_sites, 64)
    if v.dtype != jnp.float32:
        v = v.astype(jnp.float32)
    flags = build_flag_index(syndrome, l)                 # (b, n_sites) int32

    # Pad the site dim to a sublane multiple; zero rows contribute nothing.
    ns_p = ((n_sites + 7) // 8) * 8
    if ns_p != n_sites:
        v = jnp.pad(v, ((0, 0), (0, ns_p - n_sites), (0, 0)))
        flags = jnp.pad(flags, ((0, 0), (0, ns_p - n_sites)))

    vmem_limit = _vmem_limit_bytes()
    group, n_cls, nb, sites_grp, bt, tile = _choose_layout(b, ns_p, vmem_limit)

    # Fold local batch index into the class id so the grouped sites share one
    # matmul: class = flag + 64 * (batch_index % group).
    if group > 1:
        offs = (jnp.arange(b, dtype=jnp.int32) % group) * 64
        flags = flags + offs[:, None]
    vg = v.reshape(nb, sites_grp, 64)
    fg = flags.reshape(nb, 1, sites_grp)

    grid = (nb // bt, sites_grp // tile)
    class_sums = pl.pallas_call(
        _class_sum_kernel,
        out_shape=jax.ShapeDtypeStruct((nb, n_cls, 64), jnp.float32),
        grid_spec=pltpu.PrefetchScalarGridSpec(
            num_scalar_prefetch=0,
            grid=grid,
            in_specs=[
                pl.BlockSpec((bt, 1, tile), lambda bi, ti: (bi, 0, ti)),
                pl.BlockSpec((bt, tile, 64), lambda bi, ti: (bi, ti, 0)),
            ],
            out_specs=pl.BlockSpec((bt, n_cls, 64), lambda bi, ti: (bi, 0, 0)),
        ),
        compiler_params=pltpu.CompilerParams(
            dimension_semantics=("parallel", "arbitrary"),
            vmem_limit_bytes=vmem_limit),
    )(fg, vg)                                             # (nb, n_cls, 64)

    # Ungroup: class id = 64*local + flag for consecutive batch elements.
    class_sums = class_sums.reshape(b, 64, 64)

    # Tiny epilogue: contract the 64 class sums against the 64 composite
    # permutation matrices (single flat matmul, exact precision) and average.
    q = jnp.asarray(_composite_matrices_np())             # (64, 64, 64) constant
    out = jnp.dot(class_sums.reshape(b, 64 * 64), q.reshape(64 * 64, 64),
                  precision=jax.lax.Precision.HIGHEST)
    out = out * (1.0 / float(n_sites))
    return out.reshape(b, 8, 2, 2, 2)


# ----------------------------------------------------------------------------
# Pure-JAX reference mirroring the PyTorch forward (for verification)
# ----------------------------------------------------------------------------
def _apply_perm(probs, perm):
    shp = probs.shape
    flat = probs.reshape(shp[:4] + (64,))
    return flat[..., perm].reshape(shp)


def ref_forward(x, syndrome, l):
    b = x.shape[0]
    n = l ** 3
    z_synd = syndrome[:, :n]
    chans = [syndrome[:, (c + 1) * n:(c + 2) * n] for c in range(3)]
    probs = x.astype(jnp.float32)
    shape4 = (b, l, l, l)
    for axis in range(3):
        Fz = get_z_flag(z_synd, l, axis=axis, shift=0)
        flags_z = jnp.broadcast_to(jnp.transpose(Fz, (0, 2, 1))[:, None, :, :], shape4)
        probs = jnp.where(flags_z[..., None, None, None, None],
                          _apply_perm(probs, _tz_perm(axis)), probs)

        Fx = get_x_flag(chans[axis], l, axis=axis, shift=1)
        flags_x = jnp.broadcast_to(Fx[:, None, None, :], shape4)
        probs = jnp.where(flags_x[..., None, None, None, None],
                          _apply_perm(probs, _tx_perm(axis)), probs)

        probs = jnp.transpose(probs, (0, 2, 3, 1, 4, 5, 6, 7))
    return jnp.mean(probs, axis=(1, 2, 3))


if __name__ == "__main__":
    # (B=2, L=4): group=2; (B=8, L=4): group=4 + bt>1; (B=2, L=6): non-pow2 lattice.
    for (B, L) in ((2, 4), (8, 4), (2, 6)):
        key = jax.random.PRNGKey(0)
        kx, ks = jax.random.split(key)
        x = jax.random.uniform(kx, (B, L, L, L, 8, 2, 2, 2), dtype=jnp.float32)
        syndrome = jax.random.bernoulli(ks, 0.5, (B, 4 * L ** 3)).astype(jnp.int32)

        out = jax.block_until_ready(translational_equivariant_pooling_3d(x, syndrome, L))
        assert out.shape == (B, 8, 2, 2, 2)

        # Exact check of the flag / permutation / class-sum factorization:
        # feed the reference the same bf16-quantized values the MXU sees.
        x_q = x.astype(jnp.bfloat16).astype(jnp.float32)
        ref_q = jax.block_until_ready(ref_forward(x_q, syndrome, L))
        np.testing.assert_allclose(np.asarray(out), np.asarray(ref_q),
                                   rtol=1e-5, atol=1e-5)

        # Loose check against the full-f32 reference (bf16 MXU operand rounding).
        ref = jax.block_until_ready(ref_forward(x, syndrome, L))
        np.testing.assert_allclose(np.asarray(out), np.asarray(ref),
                                   rtol=2e-2, atol=2e-2)
    print("KERNEL_OK")
</pallas_src>

<mosaic_0001>
module attributes {stable_mosaic.version = 11 : i64} {
  func.func @_class_sum_kernel(%arg0: i32, %arg1: i32, %arg2: memref<1x1x128xi32, #tpu.memory_space<vmem>>, %arg3: memref<1x128x64xf32, #tpu.memory_space<vmem>>, %arg4: memref<1x128x64xf32, #tpu.memory_space<vmem>>) attributes {dimension_semantics = [#tpu.dimension_semantics<parallel>, #tpu.dimension_semantics<arbitrary>], iteration_bounds = array<i64: 1, 1>, scalar_prefetch = 0 : i64, scratch_operands = 0 : i64, tpu.core_type = #tpu.core_type<tc>, window_params = [{transform_indices = @transform_0, window_bounds = array<i64: 1, 1, 128>}, {transform_indices = @transform_1, window_bounds = array<i64: 1, 128, 64>}, {transform_indices = @transform_2, window_bounds = array<i64: 1, 128, 64>}]} {
    %c0_i32 = arith.constant 0 : i32
    %0 = arith.cmpi eq, %arg1, %c0_i32 : i32
    %1 = arith.extui %0 : i1 to i32
    %c0_i32_0 = arith.constant 0 : i32
    %2 = arith.cmpi ne, %1, %c0_i32_0 : i32
    scf.if %2 {
      %cst_12 = arith.constant 0.000000e+00 : f32
      %16 = vector.broadcast %cst_12 : f32 to vector<1x128x64xf32>
      %c0_13 = arith.constant 0 : index
      %c0_14 = arith.constant 0 : index
      %c0_15 = arith.constant 0 : index
      %17 = vector.load %arg4[%c0_13, %c0_14, %c0_15] : memref<1x128x64xf32, #tpu.memory_space<vmem>>, vector<1x128x64xf32>
      tpu.vector_store %arg4[%c0_13, %c0_14, %c0_15], %16 {strides = array<i32>} : memref<1x128x64xf32, #tpu.memory_space<vmem>>, vector<1x128x64xf32>,
    } else {
    }
    %c0 = arith.constant 0 : index
    %c0_1 = arith.constant 0 : index
    %c0_2 = arith.constant 0 : index
    %3 = vector.load %arg2[%c0, %c0_1, %c0_2] : memref<1x1x128xi32, #tpu.memory_space<vmem>>, vector<1x1x128xi32>
    %c0_3 = arith.constant 0 : index
    %c0_4 = arith.constant 0 : index
    %c0_5 = arith.constant 0 : index
    %4 = vector.load %arg3[%c0_3, %c0_4, %c0_5] : memref<1x128x64xf32, #tpu.memory_space<vmem>>, vector<1x128x64xf32>
    %5 = arith.truncf %4 : vector<1x128x64xf32> to vector<1x128x64xbf16>
    %6 = tpu.iota {dimensions = array<i32: 1>} : vector<1x128x128xi32>
    %7 = vector.broadcast %3 : vector<1x1x128xi32> to vector<1x128x128xi32>
    %8 = arith.cmpi eq, %6, %7 : vector<1x128x128xi32>
    %9 = arith.extui %8 : vector<1x128x128xi1> to vector<1x128x128xi32>
    %10 = arith.sitofp %9 : vector<1x128x128xi32> to vector<1x128x128xf32>
    %11 = arith.truncf %10 : vector<1x128x128xf32> to vector<1x128x128xbf16>
    %c0_6 = arith.constant 0 : index
    %c0_7 = arith.constant 0 : index
    %c0_8 = arith.constant 0 : index
    %12 = vector.load %arg4[%c0_6, %c0_7, %c0_8] : memref<1x128x64xf32, #tpu.memory_space<vmem>>, vector<1x128x64xf32>
    "tpu.trace_start"() <{level = 10 : i32, message = "bct,btn->bcn"}> : () -> ()
    %cst = arith.constant dense<0.000000e+00> : vector<1x128x64xf32>
    %13 = tpu.matmul %11, %5, %cst {dimension_numbers = #tpu.dot_dimension_numbers<[2], [1], [1], [2], [0, 0, 0, 1, 1, 2], [0], [0]>} : vector<1x128x128xbf16>, vector<1x128x64xbf16>, vector<1x128x64xf32> -> vector<1x128x64xf32>
    "tpu.trace_stop"() : () -> ()
    %14 = arith.addf %12, %13 : vector<1x128x64xf32>
    %c0_9 = arith.constant 0 : index
    %c0_10 = arith.constant 0 : index
    %c0_11 = arith.constant 0 : index
    %15 = vector.load %arg4[%c0_9, %c0_10, %c0_11] : memref<1x128x64xf32, #tpu.memory_space<vmem>>, vector<1x128x64xf32>
    tpu.vector_store %arg4[%c0_9, %c0_10, %c0_11], %14 {strides = array<i32>} : memref<1x128x64xf32, #tpu.memory_space<vmem>>, vector<1x128x64xf32>,
    return
  }
  func.func @transform_0(%arg0: i32, %arg1: i32) -> (i32, i32, i32) {
    %c0_i32 = arith.constant 0 : i32
    %c0_i32_0 = arith.constant 0 : i32
    return %arg0, %c0_i32, %arg1 : i32, i32, i32
  }
  func.func @transform_1(%arg0: i32, %arg1: i32) -> (i32, i32, i32) {
    %c0_i32 = arith.constant 0 : i32
    %c0_i32_0 = arith.constant 0 : i32
    return %arg0, %arg1, %c0_i32 : i32, i32, i32
  }
  func.func @transform_2(%arg0: i32, %arg1: i32) -> (i32, i32, i32) {
    %c0_i32 = arith.constant 0 : i32
    %c0_i32_0 = arith.constant 0 : i32
    %c0_i32_1 = arith.constant 0 : i32
    return %arg0, %c0_i32, %c0_i32_0 : i32, i32, i32
  }
}

</mosaic_0001>

<bundles_post_ra>
// kernel: reverse.11
= control target key start
LH: loop header
LB: loop body
LE: loop exit
PB: predicated region body
PF: predicated region fallthrough
CT: control target
= control target key end

     0   :  { %v2_v0 = vlaneseq  ;;  %s105_s0 = inlined_call_operand.vmem [shape: s32[2,3], index: 0, kind: input, shape index: {}]   ;;  %s106_s1 = inlined_call_operand.vmem [shape: s32[2,3], index: 1, kind: output, shape index: {}]  }
   0x2   :  { %v3_v1 = vsub.s32 2, %v2_v0 }
   0x4   :  { %4 = vset.pattern.permute.xlu0 %v3_v1 }
   0x5   :  { %v20_v2 = vld [vmem:[%s105_s0] sm:$0x3] }
   0x6   :  { %21 = vst [vmem:[#allocation1] sm:$0x3] %v20_v2 }
   0xd   :  { %v38_v3 = vld [vmem:[#allocation1] sm:$0x3] }
   0xe   :  { %39 = vst [vmem:[#allocation0] sm:$0x3] %v38_v3 }
  0x15   :  { %v40_v4 = vld [vmem:[#allocation0] sm:$0xff] }
  0x16   :  { %41 = vperm.xlu0 %4, %v40_v4  }
  0x95   :  { %v42_v5 = vpop.permute.xlu0 %41 }
  0x96   :  { %43 = vst [vmem:[#allocation2] sm:$0xff] %v42_v5 }
  0x9d   :  { %v47_v6 = vld [vmem:[#allocation2] sm:$0x3] }
  0x9e   :  { %49 = vst [vmem:[#allocation3] sm:$0x3] %v47_v6 }
  0xa5   :  { %v65_v7 = vld [vmem:[#allocation3] sm:$0x3] }
  0xa6   :  { %66 = vst [vmem:[%s106_s1] sm:$0x3] %v65_v7 }

// kernel: reverse.1
= control target key start
LH: loop header
LB: loop body
LE: loop exit
PB: predicated region body
PF: predicated region fallthrough
CT: control target
= control target key end

     0   :  { %v2_v0 = vlaneseq  ;;  %s147_s0 = inlined_call_operand.vmem [shape: s32[2,4,3], index: 0, kind: input, shape index: {}]   ;;  %s148_s1 = inlined_call_operand.vmem [shape: s32[2,4,3], index: 1, kind: output, shape index: {}]  }
   0x2   :  { %v3_v1 = vsub.s32 2, %v2_v0 }
   0x4   :  { %4 = vset.pattern.permute.xlu0 %v3_v1 }
   0x5   :  { %v20_v2 = vld [vmem:[%s147_s0] sm:$0xff]  }
   0x6   :  { %21 = vst [vmem:[#allocation1] sm:$0xff] %v20_v2  }
   0xd   :  { %v54_v3 = vld [vmem:[#allocation1] sm:$0xf]  ;;  %v51_v4 = vld [vmem:[#allocation1 + $0x4] sm:$0xf] }
   0xe   :  { %55 = vst [vmem:[#allocation0] sm:$0xf] %v54_v3  ;;  %53 = vst [vmem:[#allocation0 + $0x8] sm:$0xf] %v51_v4 }
  0x15   :  { %v56_v5 = vld [vmem:[#allocation0] sm:$0xff]  ;;  %v62_v6 = vld [vmem:[#allocation0 + $0x8] sm:$0xff] }
  0x16   :  { %57 = vperm.xlu0 %4, %v56_v5  }
  0x1a   :  { %63 = vperm.xlu0 %4, %v62_v6  }
  0x95   :  { %v58_v7 = vpop.permute.xlu0 %57 }
  0x96   :  { %59 = vst [vmem:[#allocation2] sm:$0xff] %v58_v7 }
  0x99   :  { %v64_v8 = vpop.permute.xlu0 %63 }
  0x9a   :  { %65 = vst [vmem:[#allocation2 + $0x8] sm:$0xff] %v64_v8 }
  0x9d   :  { %v69_v9 = vld [vmem:[#allocation2] sm:$0xf] }
  0x9e   :  { %71 = vst [vmem:[#allocation3] sm:$0xf] %v69_v9 }
  0xa1   :  { %v73_v10 = vld [vmem:[#allocation2 + $0x8] sm:$0xf] }
  0xa2   :  { %76 = vst [vmem:[#allocation3 + $0x4] sm:$0xf] %v73_v10 }
  0xa5   :  { %v92_v11 = vld [vmem:[#allocation3] sm:$0xf] }
  0xa6   :  { %93 = vst [vmem:[%s148_s1] sm:$0xf] %v92_v11 }
  0xa9   :  { %v94_v12 = vld [vmem:[#allocation3 + $0x4] sm:$0xf] }
  0xaa   :  { %95 = vst [vmem:[%s148_s1 + $0x4] sm:$0xf] %v94_v12 }

// kernel: translational_equivariant_pooling_3d.1
= control target key start
LH: loop header
LB: loop body
LE: loop exit
PB: predicated region body
PF: predicated region fallthrough
CT: control target
= control target key end

     0   :  { %v58_v0 = vlaneseq  ;;  %vm16_vm0 = vcmask 523264   ;;  %v384_v4 = vmov 0.0   ;;  %v385_v21 = vmov 1.0|1.0   ;;  %s672_s1 = inlined_call_operand.vmem [shape: f32[1,128,64], index: 1, kind: input, shape index: {}]   ;;  %s673_s2 = inlined_call_operand.vmem [shape: f32[1,128,64], index: 2, kind: output, shape index: {}]   ;;  %s674_s0 = inlined_call_operand.vmem [shape: s32[1,1,128], index: 0, kind: input, shape index: {}]  }
   0x1   :  { %v34_v1 = vld [vmem:[%s672_s1] sm:$0xff]  ;;  %v35_v2 = vld [vmem:[%s672_s1 + $0x8] sm:$0xff]  ;;  %v36_v3 = vld [vmem:[%s672_s1 + $0x10] sm:$0xff]  ;;  %19 = vst.msk [vmem:[%s673_s2 + $0x10] sm:$0xff] %vm16_vm0, %v384_v4 }
   0x2   :  { %17 = vst.msk [vmem:[%s673_s2] sm:$0xff] %vm16_vm0, %v384_v4  ;;  %18 = vst.msk [vmem:[%s673_s2 + $0x8] sm:$0xff] %vm16_vm0, %v384_v4  ;;  %v50_v5 = vpack.c.bf16 %v35_v2, %v34_v1  ;;  %v37_v6 = vld [vmem:[%s672_s1 + $0x18] sm:$0xff]  ;;  %v477_v7 = vshrl.u32 %v58_v0, 7  ;;  %v38_v9 = vld [vmem:[%s672_s1 + $0x20] sm:$0xff] }
   0x3   :  { %20 = vst.msk [vmem:[%s673_s2 + $0x18] sm:$0xff] %vm16_vm0, %v384_v4  ;;  %21 = vst.msk [vmem:[%s673_s2 + $0x20] sm:$0xff] %vm16_vm0, %v384_v4  ;;  %v51_v8 = vpack.c.bf16 %v37_v6, %v36_v3  ;;  %v39_v10 = vld [vmem:[%s672_s1 + $0x28] sm:$0xff]  ;;  %v491_v15 = vld [vmem:[%s674_s0] ss:$0 sm:$0xff] }
   0x4   :  { %22 = vst.msk [vmem:[%s673_s2 + $0x28] sm:$0xff] %vm16_vm0, %v384_v4  ;;  %23 = vst.msk [vmem:[%s673_s2 + $0x30] sm:$0xff] %vm16_vm0, %v384_v4  ;;  %334 = vmatprep.subr.bf16.mxu0 %v50_v5  ;;  %366 = vmatprep.subr.bf16.mxu1 %v50_v5  ;;  %v60_v11 = vadd.s32 8, %v477_v7  ;;  %v67_v12 = vadd.s32 64, %v477_v7  ;;  %v68_v13 = vadd.s32 72, %v477_v7  ;;  %v52_v14 = vpack.c.bf16 %v39_v10, %v38_v9  ;;  %v40_v16 = vld [vmem:[%s672_s1 + $0x30] sm:$0xff] }
   0x5   :  { %24 = vst.msk [vmem:[%s673_s2 + $0x38] sm:$0xff] %vm16_vm0, %v384_v4  ;;  %25 = vst.msk [vmem:[%s673_s2 + $0x40] sm:$0xff] %vm16_vm0, %v384_v4  ;;  %335 = vmatpush3.bf16.msra.mxu0 %v50_v5  ;;  %374 = vmatpush3.bf16.msra.mxu1 %v50_v5  ;;  %v41_v17 = vld [vmem:[%s672_s1 + $0x38] sm:$0xff]  ;;  %vm79_vm1 = vcmp.eq.s32.totalorder %v477_v7, %v491_v15  ;;  %v42_v19 = vld [vmem:[%s672_s1 + $0x40] sm:$0xff]  ;;  %v61_v31 = vadd.s32 16, %v477_v7  ;;  %v62_v32 = vadd.s32 24, %v477_v7 }
   0x6   :  { %26 = vst.msk [vmem:[%s673_s2 + $0x48] sm:$0xff] %vm16_vm0, %v384_v4  ;;  %27 = vst.msk [vmem:[%s673_s2 + $0x50] sm:$0xff] %vm16_vm0, %v384_v4  ;;  %336 = vmatprep.subr.bf16.mxu0 %v51_v8  ;;  %367 = vmatprep.subr.bf16.mxu1 %v51_v8  ;;  %vm80_vm2 = vcmp.eq.s32.totalorder %v60_v11, %v491_v15  ;;  %vm87_vm3 = vcmp.eq.s32.totalorder %v67_v12, %v491_v15  ;;  %v43_v20 = vld [vmem:[%s672_s1 + $0x48] sm:$0xff]  ;;  %v44_v23 = vld [vmem:[%s672_s1 + $0x50] sm:$0xff]  ;;  %v69_v33 = vadd.s32 80, %v477_v7 }
   0x7   :  { %28 = vst.msk [vmem:[%s673_s2 + $0x58] sm:$0xff] %vm16_vm0, %v384_v4  ;;  %29 = vst.msk [vmem:[%s673_s2 + $0x60] sm:$0xff] %vm16_vm0, %v384_v4  ;;  %vm88_vm5 = vcmp.eq.s32.totalorder %v68_v13, %v491_v15  ;;  %v53_v18 = vpack.c.bf16 %v41_v17, %v40_v16  ;;  %v54_v22 = vpack.c.bf16 %v43_v20, %v42_v19  ;;  %v45_v24 = vld [vmem:[%s672_s1 + $0x58] sm:$0xff]  ;;  %v46_v26 = vld [vmem:[%s672_s1 + $0x60] sm:$0xff]  ;;  %v70_v34 = vadd.s32 88, %v477_v7 }
   0x8   :  { %30 = vst.msk [vmem:[%s673_s2 + $0x68] sm:$0xff] %vm16_vm0, %v384_v4  ;;  %31 = vst.msk [vmem:[%s673_s2 + $0x70] sm:$0xff] %vm16_vm0, %v384_v4  ;;  %v55_v25 = vpack.c.bf16 %v45_v24, %v44_v23  ;;  %v47_v27 = vld [vmem:[%s672_s1 + $0x68] sm:$0xff]  ;;  %v48_v29 = vld [vmem:[%s672_s1 + $0x70] sm:$0xff]  ;;  %v63_v36 = vadd.s32 32, %v477_v7  ;;  %v64_v37 = vadd.s32 40, %v477_v7  ;;  %vm81_vm7 = vcmp.eq.s32.totalorder %v61_v31, %v491_v15 }
   0x9   :  { %32 = vst.msk [vmem:[%s673_s2 + $0x78] sm:$0xff] %vm16_vm0, %v384_v4  ;;  %vm302_vm4 = vmpackc.low %vm80_vm2, %vm79_vm1  ;;  %337 = vmatpush3.bf16.msra.mxu0 %v51_v8  ;;  %375 = vmatpush3.bf16.msra.mxu1 %v51_v8  ;;  %v56_v28 = vpack.c.bf16 %v47_v27, %v46_v26  ;;  %v49_v30 = vld [vmem:[%s672_s1 + $0x78] sm:$0xff]  ;;  %v71_v38 = vadd.s32 96, %v477_v7  ;;  %v72_v39 = vadd.s32 104, %v477_v7  ;;  %vm82_vm8 = vcmp.eq.s32.totalorder %v62_v32, %v491_v15  ;;  %v137_v44 = vld [vmem:[%s673_s2 + $0x10] sm:$0xff] }
   0xa   :  { %vm310_vm6 = vmpackc.low %vm88_vm5, %vm87_vm3  ;;  %338 = vmatprep.subr.bf16.mxu0 %v52_v14  ;;  %368 = vmatprep.subr.bf16.mxu1 %v52_v14  ;;  %v57_v35 = vpack.c.bf16 %v49_v30, %v48_v29  ;;  %vm89_vm9 = vcmp.eq.s32.totalorder %v69_v33, %v491_v15  ;;  %vm90_vm10 = vcmp.eq.s32.totalorder %v70_v34, %v491_v15  ;;  %v65_v40 = vadd.s32 48, %v477_v7  ;;  %v135_v46 = vld [vmem:[%s673_s2] sm:$0xff]  ;;  %v138_v50 = vld [vmem:[%s673_s2 + $0x18] sm:$0xff] }
   0xb   :  { %350 = vmatprep.mubr.msk.bf16.mxu0 %vm302_vm4, %v385_v21  ;;  %358 = vmatprep.mubr.msk.bf16.mxu1 %vm310_vm6, %v385_v21  ;;  %vm83_vm11 = vcmp.eq.s32.totalorder %v63_v36, %v491_v15  ;;  %vm84_vm12 = vcmp.eq.s32.totalorder %v64_v37, %v491_v15  ;;  %vm304_vm13 = vmpackc.low %vm82_vm8, %vm81_vm7  ;;  %vm91_vm14 = vcmp.eq.s32.totalorder %v71_v38, %v491_v15  ;;  %v66_v41 = vadd.s32 56, %v477_v7  ;;  %v136_v56 = vld [vmem:[%s673_s2 + $0x8] sm:$0xff]  ;;  %v141_v4 = vld [vmem:[%s673_s2 + $0x30] sm:$0xff] }
   0xc   :  { %vm92_vm15 = vcmp.eq.s32.totalorder %v72_v39, %v491_v15  ;;  %vm312_vm1 = vmpackc.low %vm90_vm10, %vm89_vm9  ;;  %v73_v42 = vadd.s32 112, %v477_v7  ;;  %v74_v43 = vadd.s32 120, %v477_v7  ;;  %vm85_vm4 = vcmp.eq.s32.totalorder %v65_v40, %v491_v15  ;;  %v143_v47 = vld [vmem:[%s673_s2 + $0x40] sm:$0xff]  ;;  %v142_v10 = vld [vmem:[%s673_s2 + $0x38] sm:$0xff] }
   0xd   :  { %339 = vmatpush3.bf16.msra.mxu0 %v52_v14  ;;  %376 = vmatpush3.bf16.msra.mxu1 %v52_v14  ;;  %vm306_vm2 = vmpackc.low %vm84_vm12, %vm83_vm11  ;;  %vm86_vm5 = vcmp.eq.s32.totalorder %v66_v41, %v491_v15  ;;  %v145_v45 = vld [vmem:[%s673_s2 + $0x50] sm:$0xff]  ;;  %v144_v57 = vld [vmem:[%s673_s2 + $0x48] sm:$0xff] }
   0xe   :  { %340 = vmatprep.subr.bf16.mxu0 %v53_v18  ;;  %369 = vmatprep.subr.bf16.mxu1 %v53_v18  ;;  %vm314_vm3 = vmpackc.low %vm92_vm15, %vm91_vm14  ;;  %vm93_vm6 = vcmp.eq.s32.totalorder %v73_v42, %v491_v15  ;;  %vm94_vm7 = vcmp.eq.s32.totalorder %v74_v43, %v491_v15  ;;  %v146_v51 = vld [vmem:[%s673_s2 + $0x58] sm:$0xff]  ;;  %v139_v6 = vld [vmem:[%s673_s2 + $0x20] sm:$0xff] }
   0xf   :  { %vm308_vm8 = vmpackc.low %vm86_vm5, %vm85_vm4  ;;  %v149_v5 = vld [vmem:[%s673_s2 + $0x70] sm:$0xff]  ;;  %v147_v7 = vld [vmem:[%s673_s2 + $0x60] sm:$0xff] }
  0x10   :  { %vm316_vm9 = vmpackc.low %vm94_vm7, %vm93_vm6  ;;  %v150_v11 = vld [vmem:[%s673_s2 + $0x78] sm:$0xff]  ;;  %v140_v16 = vld [vmem:[%s673_s2 + $0x28] sm:$0xff] }
  0x11   :  { %341 = vmatpush3.bf16.msra.mxu0 %v53_v18  ;;  %377 = vmatpush3.bf16.msra.mxu1 %v53_v18  ;;  %v148_v17 = vld [vmem:[%s673_s2 + $0x68] sm:$0xff] }
  0x12   :  { %342 = vmatprep.subr.bf16.mxu0 %v54_v22  ;;  %370 = vmatprep.subr.bf16.mxu1 %v54_v22 }
  0x15   :  { %343 = vmatpush3.bf16.msra.mxu0 %v54_v22  ;;  %378 = vmatpush3.bf16.msra.mxu1 %v54_v22 }
  0x16   :  { %344 = vmatprep.subr.bf16.mxu0 %v55_v25  ;;  %371 = vmatprep.subr.bf16.mxu1 %v55_v25 }
  0x19   :  { %345 = vmatpush3.bf16.msra.mxu0 %v55_v25  ;;  %379 = vmatpush3.bf16.msra.mxu1 %v55_v25 }
  0x1a   :  { %346 = vmatprep.subr.bf16.mxu0 %v56_v28  ;;  %372 = vmatprep.subr.bf16.mxu1 %v56_v28 }
  0x1d   :  { %347 = vmatpush3.bf16.msra.mxu0 %v56_v28  ;;  %380 = vmatpush3.bf16.msra.mxu1 %v56_v28 }
  0x1e   :  { %348 = vmatprep.subr.bf16.mxu0 %v57_v35  ;;  %373 = vmatprep.subr.bf16.mxu1 %v57_v35 }
  0x21   :  { %349 = vmatpush3.bf16.msra.mxu0 %v57_v35  ;;  %381 = vmatpush3.bf16.msra.mxu1 %v57_v35 }
  0x24   :  { %351 = vmatmul.mubr.msk.bf16.vlgmr.msra.gmra.mrb[0].mxu0 %vm304_vm13, %v385_v21  ;;  %359 = vmatmul.mubr.msk.bf16.vlgmr.msra.gmra.mrb[0].mxu1 %vm312_vm1, %v385_v21 }
  0x25   :  { %354 = vmatprep.mubr.msk.bf16.mxu0 %vm306_vm2, %v385_v21  ;;  %362 = vmatprep.mubr.msk.bf16.mxu1 %vm314_vm3, %v385_v21 }
  0x2c   :  { %355 = vmatmul.mubr.msk.bf16.gmra.mrb[4].mxu0 %vm308_vm8, %v385_v21  ;;  %363 = vmatmul.mubr.msk.bf16.gmra.mrb[4].mxu1 %vm316_vm9, %v385_v21 }
  0xf7   :  { %v352_v48 = vpop.f32.mrb[0].mxu0  ;;  %v360_v49 = vpop.f32.mrb[0].mxu1 }
  0xf8   :  { %v250_v52 = vadd.f32 %v352_v48, %v137_v44  ;;  %v258_v53 = vadd.f32 %v360_v49, %v145_v45  ;;  %v185_v54 = vpop.f32.mrb[1].mxu0  ;;  %v217_v55 = vpop.f32.mrb[1].mxu1 }
  0xf9   :  { %v248_v58 = vadd.f32 %v185_v54, %v135_v46  ;;  %v256_v59 = vadd.f32 %v217_v55, %v143_v47  ;;  %v353_v60 = vpop.f32.mrb[2].mxu0  ;;  %v361_v61 = vpop.f32.mrb[2].mxu1 }
  0xfa   :  { %267 = vst.msk [vmem:[%s673_s2 + $0x10] sm:$0xff] %vm16_vm0, %v250_v52  ;;  %275 = vst.msk [vmem:[%s673_s2 + $0x50] sm:$0xff] %vm16_vm0, %v258_v53  ;;  %v251_v62 = vadd.f32 %v353_v60, %v138_v50  ;;  %v259_v63 = vadd.f32 %v361_v61, %v146_v51  ;;  %v188_v0 = vpop.f32.mrb[3].mxu0  ;;  %v220_v1 = vpop.f32.mrb[3].mxu1 }
  0xfb   :  { %265 = vst.msk [vmem:[%s673_s2] sm:$0xff] %vm16_vm0, %v248_v58  ;;  %273 = vst.msk [vmem:[%s673_s2 + $0x40] sm:$0xff] %vm16_vm0, %v256_v59  ;;  %v249_v2 = vadd.f32 %v188_v0, %v136_v56  ;;  %v257_v3 = vadd.f32 %v220_v1, %v144_v57 }
  0xfc   :  { %268 = vst.msk [vmem:[%s673_s2 + $0x18] sm:$0xff] %vm16_vm0, %v251_v62  ;;  %276 = vst.msk [vmem:[%s673_s2 + $0x58] sm:$0xff] %vm16_vm0, %v259_v63 }
  0xfd   :  { %266 = vst.msk [vmem:[%s673_s2 + $0x8] sm:$0xff] %vm16_vm0, %v249_v2  ;;  %274 = vst.msk [vmem:[%s673_s2 + $0x48] sm:$0xff] %vm16_vm0, %v257_v3 }
  0xff   :  { %v356_v8 = vpop.f32.mrb[4].mxu0  ;;  %v364_v9 = vpop.f32.mrb[4].mxu1 }
 0x100   :  { %v254_v12 = vadd.f32 %v356_v8, %v141_v4  ;;  %v262_v13 = vadd.f32 %v364_v9, %v149_v5  ;;  %v201_v14 = vpop.f32.mrb[5].mxu0  ;;  %v233_v15 = vpop.f32.mrb[5].mxu1 }
 0x101   :  { %v252_v18 = vadd.f32 %v201_v14, %v139_v6  ;;  %v260_v19 = vadd.f32 %v233_v15, %v147_v7  ;;  %v357_v20 = vpop.f32.mrb[6].mxu0  ;;  %v365_v21 = vpop.f32.mrb[6].mxu1 }
 0x102   :  { %271 = vst.msk [vmem:[%s673_s2 + $0x30] sm:$0xff] %vm16_vm0, %v254_v12  ;;  %279 = vst.msk [vmem:[%s673_s2 + $0x70] sm:$0xff] %vm16_vm0, %v262_v13  ;;  %v255_v22 = vadd.f32 %v357_v20, %v142_v10  ;;  %v263_v23 = vadd.f32 %v365_v21, %v150_v11  ;;  %v204_v24 = vpop.f32.mrb[7].mxu0  ;;  %v236_v25 = vpop.f32.mrb[7].mxu1 }
 0x103   :  { %269 = vst.msk [vmem:[%s673_s2 + $0x20] sm:$0xff] %vm16_vm0, %v252_v18  ;;  %277 = vst.msk [vmem:[%s673_s2 + $0x60] sm:$0xff] %vm16_vm0, %v260_v19  ;;  %v253_v26 = vadd.f32 %v204_v24, %v140_v16  ;;  %v261_v27 = vadd.f32 %v236_v25, %v148_v17 }
 0x104   :  { %272 = vst.msk [vmem:[%s673_s2 + $0x38] sm:$0xff] %vm16_vm0, %v255_v22  ;;  %280 = vst.msk [vmem:[%s673_s2 + $0x78] sm:$0xff] %vm16_vm0, %v263_v23 }
 0x105   :  { %270 = vst.msk [vmem:[%s673_s2 + $0x28] sm:$0xff] %vm16_vm0, %v253_v26  ;;  %278 = vst.msk [vmem:[%s673_s2 + $0x68] sm:$0xff] %vm16_vm0, %v261_v27 }

</bundles_post_ra>
